<compile_context>
chip_gen: v7x
topology: tpu7x:2x2x1
jax: 0.10.0
libtpu: 0.0.40
codegen_flags: <defaults>
</compile_context>

<pallas_src>
import functools

import jax
import jax.numpy as jnp
from jax.experimental import pallas as pl
from jax.experimental.pallas import tpu as pltpu


def _round_up(x, m):
    return ((x + m - 1) // m) * m


def _forward_kernel(alpha, n_layers, mlp_out_pads, n_pad, d_task_pad, nbg_pad,
                    bg_in_ref, u_ref, x0_ref, *refs):
    """Fused context-MLP + leaky-RNN Euler step, one grid step == one time step.

    refs = [W_mlp_0..W_mlp_{L-1}, bias_stack, W_stack,
            r_hidden_out, r_act_out, bg_act_out, x_scratch, z_scratch]
    """
    w_refs = refs[:n_layers]
    bias_ref = refs[n_layers]
    wstack_ref = refs[n_layers + 1]
    rh_ref, ra_ref, bga_ref = refs[n_layers + 2:n_layers + 5]
    x_scr, z_scr = refs[n_layers + 5], refs[n_layers + 6]

    t = pl.program_id(1)

    # Load initial hidden state into the VMEM carry at the first time step of
    # each batch block (time axis is innermost).
    @pl.when(t == 0)
    def _():
        x_scr[...] = x0_ref[...]

    # ---- basal-ganglia context MLP (ReLU hidden layers, linear output) ----
    h = bg_in_ref[...]
    for li in range(n_layers):
        out_w = mlp_out_pads[li]
        b_row = bias_ref[li:li + 1, 0:out_w]          # (1, out_w), static slice
        h = jnp.dot(h, w_refs[li][...],
                    preferred_element_type=jnp.float32) + b_row
        if li < n_layers - 1:
            h = jnp.maximum(h, 0.0)
    bg_act = h
    bga_ref[...] = bg_act

    # ---- one leaky-RNN Euler step with a single fused drive matmul ----
    x = x_scr[...]
    r = jnp.tanh(x)
    # Pack [r, u_task, bg_act] into one lane-aligned operand (segments are
    # 128-multiples) and hit the MXU once against the pre-stacked weight.
    z_scr[:, 0:n_pad] = r
    z_scr[:, n_pad:n_pad + d_task_pad] = u_ref[...]
    z_scr[:, n_pad + d_task_pad:n_pad + d_task_pad + nbg_pad] = bg_act
    drive = jnp.dot(z_scr[...], wstack_ref[...],
                    preferred_element_type=jnp.float32)

    x_new = (1.0 - alpha) * x + alpha * drive
    x_scr[...] = x_new
    rh_ref[...] = x_new
    ra_ref[...] = jnp.tanh(x_new)


def rnn_multi_context_forward(bg_input_seq, u_task_seq, x0,
                              mlp_params, J, W_task, W_ctx,
                              dt=0.05, tau=0.15):
    """Run T fused steps in one pallas_call.

    bg_input_seq : [T, B, d_bg]   context-net inputs per step
    u_task_seq   : [T, B, d_task] task inputs per step
    x0           : [B, N]         initial hidden state
    Returns per-step sequences r_hidden/r_act [T,B,N], bg_act [T,B,nbg].
    (T=1 reproduces the original module's single forward call.)
    """
    T, B, d_bg = bg_input_seq.shape
    d_task = u_task_seq.shape[-1]
    N = J.shape[0]
    nbg = W_ctx.shape[0]
    n_layers = len(mlp_params)
    f32 = jnp.float32

    # ---- TPU-friendly padded shapes (lanes multiple of 128, sublanes of 8) ----
    B_pad = _round_up(B, 8) if B <= 128 else _round_up(B, 128)
    B_BLK = min(B_pad, 128)
    nb = B_pad // B_BLK
    N_pad = _round_up(N, 128)
    d_bg_pad = _round_up(d_bg, 128)
    d_task_pad = _round_up(d_task, 128)
    nbg_pad = _round_up(nbg, 128)
    K_stack = N_pad + d_task_pad + nbg_pad

    def pad2(a, r, c):
        return jnp.zeros((r, c), f32).at[:a.shape[0], :a.shape[1]].set(a.astype(f32))

    bg_seq_p = jnp.zeros((T, B_pad, d_bg_pad), f32).at[:, :B, :d_bg].set(
        bg_input_seq.astype(f32))
    u_seq_p = jnp.zeros((T, B_pad, d_task_pad), f32).at[:, :B, :d_task].set(
        u_task_seq.astype(f32))
    x0_p = pad2(x0, B_pad, N_pad)

    # MLP weights padded; all biases packed into a single [n_layers, max_out] slab.
    out_pads = tuple(_round_up(w.shape[1], 128) for (w, _) in mlp_params)
    in_pads = (d_bg_pad,) + out_pads[:-1]
    w_mlp_p = [pad2(w, in_pads[i], out_pads[i]) for i, (w, _) in enumerate(mlp_params)]
    max_out = max(out_pads)
    bias_stack = jnp.zeros((n_layers, max_out), f32)
    for i, (_, b) in enumerate(mlp_params):
        bias_stack = bias_stack.at[i, :b.shape[-1]].set(b.reshape(-1).astype(f32))

    # Pre-stack [J; W_task; W_ctx] -> single [K_stack, N_pad] weight (done once).
    w_stack = jnp.zeros((K_stack, N_pad), f32)
    w_stack = w_stack.at[:N, :N].set(J.astype(f32))
    w_stack = w_stack.at[N_pad:N_pad + d_task, :N].set(W_task.astype(f32))
    w_stack = w_stack.at[N_pad + d_task_pad:N_pad + d_task_pad + nbg, :N].set(
        W_ctx.astype(f32))
    # NOTE: for v6e/v7x, casting w_stack / w_mlp_p (and matmul operands) to
    # bf16 with f32 accumulation halves VMEM residency at full MXU rate.

    kernel = functools.partial(
        _forward_kernel, float(dt) / float(tau), n_layers, out_pads,
        N_pad, d_task_pad, nbg_pad)

    # Weights use constant index_maps -> stay VMEM-resident across the grid.
    in_specs = [
        pl.BlockSpec((None, B_BLK, d_bg_pad), lambda b, t: (t, b, 0)),    # bg input
        pl.BlockSpec((None, B_BLK, d_task_pad), lambda b, t: (t, b, 0)),  # task input
        pl.BlockSpec((B_BLK, N_pad), lambda b, t: (b, 0)),                # x0
    ]
    in_specs += [pl.BlockSpec((in_pads[i], out_pads[i]), lambda b, t: (0, 0))
                 for i in range(n_layers)]                                # MLP weights
    in_specs += [
        pl.BlockSpec((n_layers, max_out), lambda b, t: (0, 0)),           # bias slab
        pl.BlockSpec((K_stack, N_pad), lambda b, t: (0, 0)),              # stacked RNN W
    ]

    out_specs = (
        pl.BlockSpec((None, B_BLK, N_pad), lambda b, t: (t, b, 0)),
        pl.BlockSpec((None, B_BLK, N_pad), lambda b, t: (t, b, 0)),
        pl.BlockSpec((None, B_BLK, nbg_pad), lambda b, t: (t, b, 0)),
    )
    out_shape = (
        jax.ShapeDtypeStruct((T, B_pad, N_pad), f32),    # r_hidden
        jax.ShapeDtypeStruct((T, B_pad, N_pad), f32),    # r_act
        jax.ShapeDtypeStruct((T, B_pad, nbg_pad), f32),  # bg_act
    )

    rh, ra, bga = pl.pallas_call(
        kernel,
        out_shape=out_shape,
        grid_spec=pltpu.PrefetchScalarGridSpec(
            num_scalar_prefetch=0,
            grid=(nb, T),
            in_specs=in_specs,
            out_specs=out_specs,
            scratch_shapes=[
                pltpu.VMEM((B_BLK, N_pad), f32),     # hidden-state carry
                pltpu.VMEM((B_BLK, K_stack), f32),   # fused-matmul operand
            ]),
        compiler_params=pltpu.CompilerParams(
            dimension_semantics=("parallel", "arbitrary")),
    )(bg_seq_p, u_seq_p, x0_p, *w_mlp_p, bias_stack, w_stack)

    return {
        "r_hidden": rh[:, :B, :N],
        "r_act": ra[:, :B, :N],
        "bg_act": bga[:, :B, :nbg],
    }


def _reference_forward(bg_input_seq, u_task_seq, x0, mlp_params, J, W_task, W_ctx,
                       dt=0.05, tau=0.15):
    alpha = dt / tau
    x = x0
    rh, ra, bga = [], [], []
    for t in range(bg_input_seq.shape[0]):
        h = bg_input_seq[t]
        for li, (w, b) in enumerate(mlp_params):
            h = h @ w + b
            if li < len(mlp_params) - 1:
                h = jnp.maximum(h, 0.0)
        bg_act = h
        r = jnp.tanh(x)
        drive = r @ J + u_task_seq[t] @ W_task + bg_act @ W_ctx
        x = (1.0 - alpha) * x + alpha * drive
        rh.append(x)
        ra.append(jnp.tanh(x))
        bga.append(bg_act)
    return {"r_hidden": jnp.stack(rh), "r_act": jnp.stack(ra),
            "bg_act": jnp.stack(bga)}


if __name__ == "__main__":
    # Small config consistent with the module's constructor arguments.
    batch = 2
    nneurons = 32          # RNN hidden size
    nbg = 8                # contextual-input size produced by the MLP
    bg_input_size = 4      # MLP input size
    bg_layer_sizes = (16, 16)
    d_task = 4             # one extra (non-contextual) RNN input source
    g0 = 1.2
    dt, tau = 0.05, 0.15
    T = 8                  # Euler steps fused into one pallas_call

    key = jax.random.PRNGKey(0)
    keys = jax.random.split(key, 16)

    layer_dims = (bg_input_size,) + bg_layer_sizes + (nbg,)
    mlp_params = []
    for li in range(len(layer_dims) - 1):
        fan_in, fan_out = layer_dims[li], layer_dims[li + 1]
        w = jax.random.normal(keys[li], (fan_in, fan_out), jnp.float32) / jnp.sqrt(fan_in)
        b = 0.01 * jax.random.normal(keys[li + 8], (1, fan_out), jnp.float32)
        mlp_params.append((w, b))

    J = g0 / jnp.sqrt(nneurons) * jax.random.normal(
        keys[4], (nneurons, nneurons), jnp.float32)
    W_task = jax.random.normal(keys[5], (d_task, nneurons), jnp.float32) / jnp.sqrt(d_task)
    W_ctx = jax.random.normal(keys[6], (nbg, nneurons), jnp.float32) / jnp.sqrt(nbg)

    bg_input_seq = jax.random.normal(keys[7], (T, batch, bg_input_size), jnp.float32)
    u_task_seq = jax.random.normal(keys[12], (T, batch, d_task), jnp.float32)
    x0 = jnp.zeros((batch, nneurons), jnp.float32)   # initial hidden state

    out = rnn_multi_context_forward(bg_input_seq, u_task_seq, x0, mlp_params,
                                    J, W_task, W_ctx, dt=dt, tau=tau)
    out = jax.block_until_ready(out)

    ref = _reference_forward(bg_input_seq, u_task_seq, x0, mlp_params,
                             J, W_task, W_ctx, dt=dt, tau=tau)
    for k in ("r_hidden", "r_act", "bg_act"):
        assert jnp.allclose(out[k], ref[k], atol=1e-4, rtol=1e-3), k

    print("KERNEL_OK")
</pallas_src>

<mosaic_0001>
module attributes {stable_mosaic.version = 11 : i64} {
  func.func @_forward_kernel(%arg0: i32, %arg1: i32, %arg2: memref<1x8x128xf32, #tpu.memory_space<vmem>>, %arg3: memref<1x8x128xf32, #tpu.memory_space<vmem>>, %arg4: memref<8x128xf32, #tpu.memory_space<vmem>>, %arg5: memref<128x128xf32, #tpu.memory_space<vmem>>, %arg6: memref<128x128xf32, #tpu.memory_space<vmem>>, %arg7: memref<128x128xf32, #tpu.memory_space<vmem>>, %arg8: memref<3x128xf32, #tpu.memory_space<vmem>>, %arg9: memref<384x128xf32, #tpu.memory_space<vmem>>, %arg10: memref<1x8x128xf32, #tpu.memory_space<vmem>>, %arg11: memref<1x8x128xf32, #tpu.memory_space<vmem>>, %arg12: memref<1x8x128xf32, #tpu.memory_space<vmem>>, %arg13: memref<8x128xf32, #tpu.memory_space<vmem>>, %arg14: memref<8x384xf32, #tpu.memory_space<vmem>>) attributes {dimension_semantics = [#tpu.dimension_semantics<parallel>, #tpu.dimension_semantics<arbitrary>], iteration_bounds = array<i64: 1, 8>, scalar_prefetch = 0 : i64, scratch_operands = 2 : i64, tpu.core_type = #tpu.core_type<tc>, window_params = [{transform_indices = @transform_0, window_bounds = array<i64: 1, 8, 128>}, {transform_indices = @transform_1, window_bounds = array<i64: 1, 8, 128>}, {transform_indices = @transform_2, window_bounds = array<i64: 8, 128>}, {pipeline_mode = #tpu.pipeline_mode<synchronous>, transform_indices = @transform_3, window_bounds = array<i64: 128, 128>}, {pipeline_mode = #tpu.pipeline_mode<synchronous>, transform_indices = @transform_4, window_bounds = array<i64: 128, 128>}, {pipeline_mode = #tpu.pipeline_mode<synchronous>, transform_indices = @transform_5, window_bounds = array<i64: 128, 128>}, {pipeline_mode = #tpu.pipeline_mode<synchronous>, transform_indices = @transform_6, window_bounds = array<i64: 3, 128>}, {pipeline_mode = #tpu.pipeline_mode<synchronous>, transform_indices = @transform_7, window_bounds = array<i64: 384, 128>}, {transform_indices = @transform_8, window_bounds = array<i64: 1, 8, 128>}, {transform_indices = @transform_9, window_bounds = array<i64: 1, 8, 128>}, {transform_indices = @transform_10, window_bounds = array<i64: 1, 8, 128>}]} {
    %c0_i32 = arith.constant 0 : i32
    %0 = arith.cmpi eq, %arg1, %c0_i32 : i32
    %1 = arith.extui %0 : i1 to i32
    %c0_i32_0 = arith.constant 0 : i32
    %2 = arith.cmpi ne, %1, %c0_i32_0 : i32
    scf.if %2 {
      %c0_44 = arith.constant 0 : index
      %c0_45 = arith.constant 0 : index
      %50 = vector.load %arg4[%c0_44, %c0_45] : memref<8x128xf32, #tpu.memory_space<vmem>>, vector<8x128xf32>
      %c0_46 = arith.constant 0 : index
      %c0_47 = arith.constant 0 : index
      %51 = vector.load %arg13[%c0_46, %c0_47] : memref<8x128xf32, #tpu.memory_space<vmem>>, vector<8x128xf32>
      tpu.vector_store %arg13[%c0_46, %c0_47], %50 {strides = array<i32>} : memref<8x128xf32, #tpu.memory_space<vmem>>, vector<8x128xf32>,
    } else {
    }
    %c0 = arith.constant 0 : index
    %c0_1 = arith.constant 0 : index
    %c0_2 = arith.constant 0 : index
    %3 = vector.load %arg2[%c0, %c0_1, %c0_2] : memref<1x8x128xf32, #tpu.memory_space<vmem>>, vector<1x8x128xf32>
    %4 = vector.shape_cast %3 : vector<1x8x128xf32> to vector<8x128xf32>
    %c0_3 = arith.constant 0 : index
    %c0_4 = arith.constant 0 : index
    %5 = vector.load %arg8[%c0_3, %c0_4] : memref<3x128xf32, #tpu.memory_space<vmem>>, vector<1x128xf32>
    %c0_5 = arith.constant 0 : index
    %c0_6 = arith.constant 0 : index
    %6 = vector.load %arg5[%c0_5, %c0_6] : memref<128x128xf32, #tpu.memory_space<vmem>>, vector<128x128xf32>
    %cst = arith.constant dense<0.000000e+00> : vector<8x128xf32>
    %7 = tpu.matmul %4, %6, %cst {dimension_numbers = #tpu.dot_dimension_numbers<[1], [0], [0], [1], [0, 0, 1, 1], [], []>} : vector<8x128xf32>, vector<128x128xf32>, vector<8x128xf32> -> vector<8x128xf32>
    %8 = vector.broadcast %5 : vector<1x128xf32> to vector<8x128xf32>
    %9 = arith.addf %7, %8 : vector<8x128xf32>
    %cst_7 = arith.constant 0.000000e+00 : f32
    %10 = vector.broadcast %cst_7 : f32 to vector<8x128xf32>
    %11 = arith.maximumf %9, %10 : vector<8x128xf32>
    %c1 = arith.constant 1 : index
    %c0_8 = arith.constant 0 : index
    %12 = vector.load %arg8[%c1, %c0_8] : memref<3x128xf32, #tpu.memory_space<vmem>>, vector<1x128xf32>
    %c0_9 = arith.constant 0 : index
    %c0_10 = arith.constant 0 : index
    %13 = vector.load %arg6[%c0_9, %c0_10] : memref<128x128xf32, #tpu.memory_space<vmem>>, vector<128x128xf32>
    %cst_11 = arith.constant dense<0.000000e+00> : vector<8x128xf32>
    %14 = tpu.matmul %11, %13, %cst_11 {dimension_numbers = #tpu.dot_dimension_numbers<[1], [0], [0], [1], [0, 0, 1, 1], [], []>} : vector<8x128xf32>, vector<128x128xf32>, vector<8x128xf32> -> vector<8x128xf32>
    %15 = vector.broadcast %12 : vector<1x128xf32> to vector<8x128xf32>
    %16 = arith.addf %14, %15 : vector<8x128xf32>
    %cst_12 = arith.constant 0.000000e+00 : f32
    %17 = vector.broadcast %cst_12 : f32 to vector<8x128xf32>
    %18 = arith.maximumf %16, %17 : vector<8x128xf32>
    %c2 = arith.constant 2 : index
    %c0_13 = arith.constant 0 : index
    %19 = vector.load %arg8[%c2, %c0_13] : memref<3x128xf32, #tpu.memory_space<vmem>>, vector<1x128xf32>
    %c0_14 = arith.constant 0 : index
    %c0_15 = arith.constant 0 : index
    %20 = vector.load %arg7[%c0_14, %c0_15] : memref<128x128xf32, #tpu.memory_space<vmem>>, vector<128x128xf32>
    %cst_16 = arith.constant dense<0.000000e+00> : vector<8x128xf32>
    %21 = tpu.matmul %18, %20, %cst_16 {dimension_numbers = #tpu.dot_dimension_numbers<[1], [0], [0], [1], [0, 0, 1, 1], [], []>} : vector<8x128xf32>, vector<128x128xf32>, vector<8x128xf32> -> vector<8x128xf32>
    %22 = vector.broadcast %19 : vector<1x128xf32> to vector<8x128xf32>
    %23 = arith.addf %21, %22 : vector<8x128xf32>
    %c0_17 = arith.constant 0 : index
    %c0_18 = arith.constant 0 : index
    %c0_19 = arith.constant 0 : index
    %24 = vector.load %arg12[%c0_17, %c0_18, %c0_19] : memref<1x8x128xf32, #tpu.memory_space<vmem>>, vector<1x8x128xf32>
    %25 = vector.shape_cast %24 : vector<1x8x128xf32> to vector<8x128xf32>
    %26 = vector.shape_cast %23 : vector<8x128xf32> to vector<1x8x128xf32>
    tpu.vector_store %arg12[%c0_17, %c0_18, %c0_19], %26 {strides = array<i32>} : memref<1x8x128xf32, #tpu.memory_space<vmem>>, vector<1x8x128xf32>,
    %c0_20 = arith.constant 0 : index
    %c0_21 = arith.constant 0 : index
    %27 = vector.load %arg13[%c0_20, %c0_21] : memref<8x128xf32, #tpu.memory_space<vmem>>, vector<8x128xf32>
    %28 = math.tanh %27 : vector<8x128xf32>
    %c0_22 = arith.constant 0 : index
    %c0_23 = arith.constant 0 : index
    %29 = vector.load %arg14[%c0_22, %c0_23] : memref<8x384xf32, #tpu.memory_space<vmem>>, vector<8x128xf32>
    tpu.vector_store %arg14[%c0_22, %c0_23], %28 {strides = array<i32>} : memref<8x384xf32, #tpu.memory_space<vmem>>, vector<8x128xf32>,
    %c0_24 = arith.constant 0 : index
    %c0_25 = arith.constant 0 : index
    %c0_26 = arith.constant 0 : index
    %30 = vector.load %arg3[%c0_24, %c0_25, %c0_26] : memref<1x8x128xf32, #tpu.memory_space<vmem>>, vector<1x8x128xf32>
    %31 = vector.shape_cast %30 : vector<1x8x128xf32> to vector<8x128xf32>
    %c0_27 = arith.constant 0 : index
    %c128 = arith.constant 128 : index
    %32 = vector.load %arg14[%c0_27, %c128] : memref<8x384xf32, #tpu.memory_space<vmem>>, vector<8x128xf32>
    tpu.vector_store %arg14[%c0_27, %c128], %31 {strides = array<i32>} : memref<8x384xf32, #tpu.memory_space<vmem>>, vector<8x128xf32>,
    %c0_28 = arith.constant 0 : index
    %c256 = arith.constant 256 : index
    %33 = vector.load %arg14[%c0_28, %c256] : memref<8x384xf32, #tpu.memory_space<vmem>>, vector<8x128xf32>
    tpu.vector_store %arg14[%c0_28, %c256], %23 {strides = array<i32>} : memref<8x384xf32, #tpu.memory_space<vmem>>, vector<8x128xf32>,
    %c0_29 = arith.constant 0 : index
    %c0_30 = arith.constant 0 : index
    %34 = vector.load %arg14[%c0_29, %c0_30] : memref<8x384xf32, #tpu.memory_space<vmem>>, vector<8x384xf32>
    %c0_31 = arith.constant 0 : index
    %c0_32 = arith.constant 0 : index
    %35 = vector.load %arg9[%c0_31, %c0_32] : memref<384x128xf32, #tpu.memory_space<vmem>>, vector<384x128xf32>
    %cst_33 = arith.constant dense<0.000000e+00> : vector<8x128xf32>
    %36 = tpu.matmul %34, %35, %cst_33 {dimension_numbers = #tpu.dot_dimension_numbers<[1], [0], [0], [1], [0, 0, 1, 1], [], []>} : vector<8x384xf32>, vector<384x128xf32>, vector<8x128xf32> -> vector<8x128xf32>
    %cst_34 = arith.constant 0.666666686 : f32
    %37 = vector.broadcast %cst_34 : f32 to vector<8x128xf32>
    %38 = arith.mulf %37, %27 : vector<8x128xf32>
    %cst_35 = arith.constant 0.333333343 : f32
    %39 = vector.broadcast %cst_35 : f32 to vector<8x128xf32>
    %40 = arith.mulf %39, %36 : vector<8x128xf32>
    %41 = arith.addf %38, %40 : vector<8x128xf32>
    %c0_36 = arith.constant 0 : index
    %c0_37 = arith.constant 0 : index
    %42 = vector.load %arg13[%c0_36, %c0_37] : memref<8x128xf32, #tpu.memory_space<vmem>>, vector<8x128xf32>
    tpu.vector_store %arg13[%c0_36, %c0_37], %41 {strides = array<i32>} : memref<8x128xf32, #tpu.memory_space<vmem>>, vector<8x128xf32>,
    %c0_38 = arith.constant 0 : index
    %c0_39 = arith.constant 0 : index
    %c0_40 = arith.constant 0 : index
    %43 = vector.load %arg10[%c0_38, %c0_39, %c0_40] : memref<1x8x128xf32, #tpu.memory_space<vmem>>, vector<1x8x128xf32>
    %44 = vector.shape_cast %43 : vector<1x8x128xf32> to vector<8x128xf32>
    %45 = vector.shape_cast %41 : vector<8x128xf32> to vector<1x8x128xf32>
    tpu.vector_store %arg10[%c0_38, %c0_39, %c0_40], %45 {strides = array<i32>} : memref<1x8x128xf32, #tpu.memory_space<vmem>>, vector<1x8x128xf32>,
    %46 = math.tanh %41 : vector<8x128xf32>
    %c0_41 = arith.constant 0 : index
    %c0_42 = arith.constant 0 : index
    %c0_43 = arith.constant 0 : index
    %47 = vector.load %arg11[%c0_41, %c0_42, %c0_43] : memref<1x8x128xf32, #tpu.memory_space<vmem>>, vector<1x8x128xf32>
    %48 = vector.shape_cast %47 : vector<1x8x128xf32> to vector<8x128xf32>
    %49 = vector.shape_cast %46 : vector<8x128xf32> to vector<1x8x128xf32>
    tpu.vector_store %arg11[%c0_41, %c0_42, %c0_43], %49 {strides = array<i32>} : memref<1x8x128xf32, #tpu.memory_space<vmem>>, vector<1x8x128xf32>,
    return
  }
  func.func @transform_0(%arg0: i32, %arg1: i32) -> (i32, i32, i32) {
    %c0_i32 = arith.constant 0 : i32
    %c0_i32_0 = arith.constant 0 : i32
    return %arg1, %arg0, %c0_i32 : i32, i32, i32
  }
  func.func @transform_1(%arg0: i32, %arg1: i32) -> (i32, i32, i32) {
    %c0_i32 = arith.constant 0 : i32
    %c0_i32_0 = arith.constant 0 : i32
    return %arg1, %arg0, %c0_i32 : i32, i32, i32
  }
  func.func @transform_2(%arg0: i32, %arg1: i32) -> (i32, i32) {
    %c0_i32 = arith.constant 0 : i32
    %c0_i32_0 = arith.constant 0 : i32
    return %arg0, %c0_i32 : i32, i32
  }
  func.func @transform_3(%arg0: i32, %arg1: i32) -> (i32, i32) {
    %c0_i32 = arith.constant 0 : i32
    %c0_i32_0 = arith.constant 0 : i32
    %c0_i32_1 = arith.constant 0 : i32
    return %c0_i32, %c0_i32_0 : i32, i32
  }
  func.func @transform_4(%arg0: i32, %arg1: i32) -> (i32, i32) {
    %c0_i32 = arith.constant 0 : i32
    %c0_i32_0 = arith.constant 0 : i32
    %c0_i32_1 = arith.constant 0 : i32
    return %c0_i32, %c0_i32_0 : i32, i32
  }
  func.func @transform_5(%arg0: i32, %arg1: i32) -> (i32, i32) {
    %c0_i32 = arith.constant 0 : i32
    %c0_i32_0 = arith.constant 0 : i32
    %c0_i32_1 = arith.constant 0 : i32
    return %c0_i32, %c0_i32_0 : i32, i32
  }
  func.func @transform_6(%arg0: i32, %arg1: i32) -> (i32, i32) {
    %c0_i32 = arith.constant 0 : i32
    %c0_i32_0 = arith.constant 0 : i32
    %c0_i32_1 = arith.constant 0 : i32
    return %c0_i32, %c0_i32_0 : i32, i32
  }
  func.func @transform_7(%arg0: i32, %arg1: i32) -> (i32, i32) {
    %c0_i32 = arith.constant 0 : i32
    %c0_i32_0 = arith.constant 0 : i32
    %c0_i32_1 = arith.constant 0 : i32
    return %c0_i32, %c0_i32_0 : i32, i32
  }
  func.func @transform_8(%arg0: i32, %arg1: i32) -> (i32, i32, i32) {
    %c0_i32 = arith.constant 0 : i32
    %c0_i32_0 = arith.constant 0 : i32
    return %arg1, %arg0, %c0_i32 : i32, i32, i32
  }
  func.func @transform_9(%arg0: i32, %arg1: i32) -> (i32, i32, i32) {
    %c0_i32 = arith.constant 0 : i32
    %c0_i32_0 = arith.constant 0 : i32
    return %arg1, %arg0, %c0_i32 : i32, i32, i32
  }
  func.func @transform_10(%arg0: i32, %arg1: i32) -> (i32, i32, i32) {
    %c0_i32 = arith.constant 0 : i32
    %c0_i32_0 = arith.constant 0 : i32
    return %arg1, %arg0, %c0_i32 : i32, i32, i32
  }
}

</mosaic_0001>

<bundles_post_ra>
// kernel: tpu_custom_call.1
= control target key start
LH: loop header
LB: loop body
LE: loop exit
PB: predicated region body
PF: predicated region fallthrough
CT: control target
= control target key end

     0   :  { %s2763_s0 = inlined_call_operand.hbm [shape: f32[8,8,128], index: 0, kind: input, shape index: {}]   ;;  %s2764_s1 = inlined_call_operand.hbm [shape: f32[8,8,128], index: 1, kind: input, shape index: {}]   ;;  %s2765_s2 = inlined_call_operand.hbm [shape: f32[8,128], index: 2, kind: input, shape index: {}]   ;;  %s2766_s3 = inlined_call_operand.hbm [shape: f32[128,128], index: 3, kind: input, shape index: {}]   ;;  %s2767_s4 = inlined_call_operand.hbm [shape: f32[128,128], index: 4, kind: input, shape index: {}]   ;;  %s2768_s5 = inlined_call_operand.hbm [shape: f32[128,128], index: 5, kind: input, shape index: {}]   ;;  %s2769_s6 = inlined_call_operand.vmem [shape: f32[3,128], index: 6, kind: input, shape index: {}]   ;;  %s2770_s7 = inlined_call_operand.hbm [shape: f32[384,128], index: 7, kind: input, shape index: {}]   ;;  %s2771_s8 = inlined_call_operand.hbm [shape: f32[8,8,128], index: 8, kind: output, shape index: {0}]   ;;  %s2772_s9 = inlined_call_operand.hbm [shape: f32[8,8,128], index: 9, kind: output, shape index: {1}]   ;;  %s2773_s10 = inlined_call_operand.hbm [shape: f32[8,8,128], index: 10, kind: output, shape index: {2}]  }
   0x1   :  { %2783 = sst [smem:[#allocation28_spill]] %s2765_s2 }
   0x2   :  { %2784 = sst [smem:[#allocation29_spill]] %s2766_s3 }
   0x3   :  { %2785 = sst [smem:[#allocation30_spill]] %s2767_s4 }
   0x4   :  { %2786 = sst [smem:[#allocation31_spill]] %s2768_s5 }
   0x5   :  { %2787 = sst [smem:[#allocation32_spill]] %s2770_s7 }
   0x6   :  { %2788 = sst [smem:[#allocation33_spill]] %s2771_s8 }
   0x7   :  { %2789 = sst [smem:[#allocation34_spill]] %s2772_s9 }
   0x8   :  { %2790 = sst [smem:[#allocation35_spill]] %s2773_s10 }
   0x9   :  { %16 = vsyncpa [#allocation5], 0 }
   0xa   :  { %18 = vsyncpa [#allocation5 + $0x1], 0 }
   0xb   :  { %19 = vsyncpa [#allocation8], 0 }
   0xc   :  { %21 = vsyncpa [#allocation8 + $0x1], 0 }
   0xd   :  { %22 = vsyncpa [#allocation11], 0 }
   0xe   :  { %23 = vsyncpa [#allocation14], 0 }
   0xf   :  { %24 = vsyncpa [#allocation6], 0 }
  0x10   :  { %26 = vsyncpa [#allocation6 + $0x1], 0 }
  0x11   :  { %27 = vsyncpa [#allocation18], 0 }
  0x12   :  { %29 = vsyncpa [#allocation18 + $0x1], 0  ;;  %s2261_s13 = smov 0   ;;  %s2263_s14 = smov 0  }
  0x13   :  { %s2265_s15 = smov 0   ;;  %s2267_s16 = smov 0  }
  0x14   :  { %s2269_s17 = smov 0   ;;  %s2271_s18 = smov 0  }
  0x15 LB: > { %s2292_s19 = sadd.s32 4294967295, %s2189_s18   ;;  %p1289_p0 = scmp.ge.s32.totalorder %s2189_s18, 1  ;;  %s2189_s18 = sphi %s2271_s18, %s35_s18   ;;  %s2185_s17 = sphi %s2269_s17, %s2825_s17   ;;  %s2181_s16 = sphi %s2267_s16, %s2824_s16   ;;  %s2177_s15 = sphi %s2265_s15, %s2823_s15   ;;  %s2173_s14 = sphi %s2263_s14, %s2822_s14   ;;  %s2169_s13 = sphi %s2261_s13, %s2821_s13  }
  0x16   : > { %p2774_p1 = scmp.eq.s32.totalorder %s2292_s19, 0  ;;  %p323_p2 = scmp.lt.s32.totalorder %s2189_s18, 9 }
  0x17   : > { %s2191_s21 = smov [#allocation9]   ;;  %s2192_s23 = smov [#allocation10]  }
  0x18   : > { %p2297_p3 = pnand %p1289_p0, %p323_p2  ;;  %s338_s22 = sshll.u32 %s2191_s21, 4  ;;  %s339_s22 = int_to_ptr.vmem [resolvable:$true] %s338_s22 }
  0x19   : > { %s348_s24 = sshll.u32 %s2192_s23, 4  ;;  %s2193_s26 = smov [#allocation13]   ;;  %s2309_s24 = int_to_ptr.vmem [resolvable:$true] %s348_s24 }
  0x1a   : > { %s2791_s20 = scalar_select %p2297_p3, 1, 0 }
  0x1b   : > { %p1724_p4 = pneg %p2297_p3  ;;  %s2311_s27 = sshll.u32 %s2193_s26, 4  ;;  %s375_s27 = int_to_ptr.vmem [resolvable:$true] %s2311_s27 }
  0x1c   : > { %s2793_s2 = sld [smem:[#allocation28_spill]] }
  0x1d   : > { %p2305_p5 = pnand %p1724_p4, %p2774_p1 }
  0x1f   : > { %p2321_p7 = pneg %p2305_p5 }
  0x22   : > { %s1831_s30 = scalar_lea.hbm %s2793_s2, 128 }
  0x23   : > { %p1832_p6 = scmp.ne.s32.totalorder %s2793_s2, %s1831_s30  ;;  %p1838_p10 = scmp.lt.u32.totalorder %s1831_s30, %s2793_s2 }
  0x25   : > { %p1834_p8 = pnand %p2321_p7, %p1832_p6 }
  0x27   : > { %p1835_p9 = pneg %p1834_p8 }
  0x29   : > { %p1840_p11 = pnand %p1838_p10, %p1835_p9 }
  0x2b   : > { %1843 = shalt.err (!%p1840_p11)
}
  0x2c   : > { %s1844_s28 = scalar_lea.vmem %s339_s22, 128  ;;  %p1852_p2 = scmp.lt.s32.totalorder %s339_s22, %s339_s22 }
  0x2d   : > { %p1845_p12 = scmp.ne.s32.totalorder %s339_s22, %s1844_s28  ;;  %p1853_p4 = scmp.lt.s32.totalorder %s1844_s28, %s1844_s28 }
  0x2f   : > { %p1847_p13 = pnand %p1845_p12, %p2321_p7  ;;  %p1854_p1 = por %p1853_p4, %p1852_p2 }
  0x31   : > { %p1848_p0 = pneg %p1847_p13 }
  0x33   : > { %p1855_p3 = pnand %p1854_p1, %p1848_p0 }
  0x35   : > { %1858 = shalt.err (!%p1855_p3)
}
  0x36   : > { %1727 = dma.hbm_to_vmem [thread:$0]  (!%p2305_p5), %s2793_s2, 128, %s339_s22, [#allocation8]  }
  0x37   : > { %s2795_s3 = sld [smem:[#allocation29_spill]] }
  0x3d   : > { %s1859_s23 = scalar_lea.hbm %s2795_s3, 2048 }
  0x3e   : > { %p1860_p6 = scmp.ne.s32.totalorder %s2795_s3, %s1859_s23  ;;  %p1866_p1 = scmp.lt.u32.totalorder %s1859_s23, %s2795_s3 }
  0x40   : > { %p1862_p8 = pnand %p1860_p6, %p2321_p7 }
  0x42   : > { %p1863_p9 = pneg %p1862_p8 }
  0x44   : > { %p1868_p3 = pnand %p1866_p1, %p1863_p9 }
  0x46   : > { %1871 = shalt.err (!%p1868_p3)
}
  0x47   : > { %s1872_s22 = scalar_lea.vmem %s2309_s24, 2048  ;;  %p1880_p13 = scmp.lt.s32.totalorder %s2309_s24, %s2309_s24 }
  0x48   : > { %p1873_p10 = scmp.ne.s32.totalorder %s2309_s24, %s1872_s22  ;;  %p1881_p0 = scmp.lt.s32.totalorder %s1872_s22, %s1872_s22 }
  0x4a   : > { %p1875_p11 = pnand %p1873_p10, %p2321_p7  ;;  %p1882_p2 = por %p1881_p0, %p1880_p13 }
  0x4c   : > { %p1876_p12 = pneg %p1875_p11 }
  0x4e   : > { %p1883_p4 = pnand %p1882_p2, %p1876_p12 }
  0x50   : > { %1886 = shalt.err (!%p1883_p4)
}
  0x51   : > { %s2194_s10 = smov 128   ;;  %s2195_s9 = smov 8  }
  0x52   : > { %1730 = dma.hbm_to_vmem [thread:$0]  (!%p2305_p5), %s2795_s3, 2048, %s2309_s24, [#allocation11], %s2194_s10, %s2194_s10, %s2195_s9  }
  0x53   : > { %s2796_s5 = sld [smem:[#allocation31_spill]] }
  0x59   : > { %s1887_s23 = scalar_lea.hbm %s2796_s5, 2048 }
  0x5a   : > { %p1888_p6 = scmp.ne.s32.totalorder %s2796_s5, %s1887_s23  ;;  %p1894_p1 = scmp.lt.u32.totalorder %s1887_s23, %s2796_s5 }
  0x5c   : > { %p1890_p8 = pnand %p1888_p6, %p2321_p7 }
  0x5e   : > { %p1891_p9 = pneg %p1890_p8 }
  0x60   : > { %p1896_p3 = pnand %p1894_p1, %p1891_p9 }
  0x62   : > { %1899 = shalt.err (!%p1896_p3)
}
  0x63   : > { %s1900_s29 = scalar_lea.vmem %s375_s27, 2048  ;;  %p1908_p13 = scmp.lt.s32.totalorder %s375_s27, %s375_s27 }
  0x64   : > { %p1901_p10 = scmp.ne.s32.totalorder %s375_s27, %s1900_s29  ;;  %p1909_p0 = scmp.lt.s32.totalorder %s1900_s29, %s1900_s29 }
  0x66   : > { %p1903_p11 = pnand %p1901_p10, %p2321_p7  ;;  %p1910_p2 = por %p1909_p0, %p1908_p13 }
  0x68   : > { %p1904_p12 = pneg %p1903_p11 }
  0x6a   : > { %p1911_p4 = pnand %p1910_p2, %p1904_p12 }
  0x6c   : > { %1914 = shalt.err (!%p1911_p4)
}
  0x6d   : > { %1736 = dma.hbm_to_vmem [thread:$0]  (!%p2305_p5), %s2796_s5, 2048, %s375_s27, [#allocation14], %s2194_s10, %s2194_s10, %s2195_s9  }
  0x6e   : > { %s2196_s11 = smov [#allocation12]   ;;  %s2197_s12 = smov [#allocation15]  }
  0x6f   : > { %s361_s30 = sshll.u32 %s2196_s11, 4  ;;  %s390_s23 = sshll.u32 %s2197_s12, 4  ;;  %s362_s30 = int_to_ptr.vmem [resolvable:$true] %s361_s30  ;;  %s391_s23 = int_to_ptr.vmem [resolvable:$true] %s390_s23 }
  0x70   : > { %s2797_s4 = sld [smem:[#allocation30_spill]] }
  0x76   : > { %s1915_s22 = scalar_lea.hbm %s2797_s4, 2048 }
  0x77   : > { %p1916_p6 = scmp.ne.s32.totalorder %s2797_s4, %s1915_s22  ;;  %p1922_p1 = scmp.lt.u32.totalorder %s1915_s22, %s2797_s4 }
  0x79   : > { %p1918_p8 = pnand %p1916_p6, %p2321_p7 }
  0x7b   : > { %p1919_p9 = pneg %p1918_p8 }
  0x7d   : > { %p1924_p3 = pnand %p1922_p1, %p1919_p9 }
  0x7f   : > { %1927 = shalt.err (!%p1924_p3)
}
  0x80   : > { %s1928_s27 = scalar_lea.vmem %s362_s30, 2048  ;;  %p1936_p13 = scmp.lt.s32.totalorder %s362_s30, %s362_s30 }
  0x81   : > { %p1929_p10 = scmp.ne.s32.totalorder %s362_s30, %s1928_s27  ;;  %p1937_p0 = scmp.lt.s32.totalorder %s1928_s27, %s1928_s27 }
  0x83   : > { %p1931_p11 = pnand %p1929_p10, %p2321_p7  ;;  %p1938_p2 = por %p1937_p0, %p1936_p13 }
  0x85   : > { %p1932_p12 = pneg %p1931_p11 }
  0x87   : > { %p1939_p4 = pnand %p1938_p2, %p1932_p12 }
  0x89   : > { %1942 = shalt.err (!%p1939_p4)
}
  0x8a   : > { %1733 = dma.hbm_to_vmem [thread:$0]  (!%p2305_p5), %s2797_s4, 2048, %s362_s30, [#allocation11], %s2194_s10, %s2194_s10, %s2195_s9  }
  0x8b   : > { %s2798_s7 = sld [smem:[#allocation32_spill]] }
  0x91   : > { %s1943_s12 = scalar_lea.hbm %s2798_s7, 6144 }
  0x92   : > { %p1944_p6 = scmp.ne.s32.totalorder %s2798_s7, %s1943_s12  ;;  %p1950_p1 = scmp.lt.u32.totalorder %s1943_s12, %s2798_s7 }
  0x94   : > { %p1946_p8 = pnand %p1944_p6, %p2321_p7 }
  0x96   : > { %p1947_p9 = pneg %p1946_p8 }
  0x98   : > { %p1952_p3 = pnand %p1950_p1, %p1947_p9 }
  0x9a   : > { %1955 = shalt.err (!%p1952_p3)
}
  0x9b   : > { %s1956_s2 = scalar_lea.vmem %s391_s23, 6144  ;;  %p1964_p13 = scmp.lt.s32.totalorder %s391_s23, %s391_s23 }
  0x9c   : > { %p1957_p10 = scmp.ne.s32.totalorder %s391_s23, %s1956_s2  ;;  %p1965_p0 = scmp.lt.s32.totalorder %s1956_s2, %s1956_s2 }
  0x9e   : > { %p1959_p11 = pnand %p1957_p10, %p2321_p7  ;;  %p1966_p2 = por %p1965_p0, %p1964_p13 }
  0xa0   : > { %p1960_p12 = pneg %p1959_p11 }
  0xa2   : > { %p1967_p4 = pnand %p1966_p2, %p1960_p12 }
  0xa4   : > { %1970 = shalt.err (!%p1967_p4)
}
  0xa5   : > { %1739 = dma.hbm_to_vmem [thread:$0]  (!%p2305_p5), %s2798_s7, 6144, %s391_s23, [#allocation14], %s2194_s10, %s2194_s10, %s2195_s9  }
  0xa6   : > { %s2779_s25 = sadd.s32 4294967294, %s2189_s18   ;;  %s44_s21 = sadd.s32 1, %s2185_s17 }
  0xa7   : > { %s56_s3 = sadd.s32 1, %s2177_s15  ;;  %p45_p7 = scmp.ge.s32.totalorder %s44_s21, 8 }
  0xa8   : > { %p63_p6 = scmp.ne.s32.totalorder %s2177_s15, %s2173_s14  ;;  %p64_p8 = scmp.eq.s32.totalorder %s2189_s18, 0 }
  0xa9   : > { %p69_p9 = scmp.ne.s32.totalorder %s2173_s14, %s2169_s13  ;;  %s2827_s21 = smov (%p45_p7, %s44_s21), 0 }
  0xaa   : > { %2799 = sst [smem:[#allocation27_spill]] %s2827_s21  ;;  %p2437_p1 = por %p64_p8, %p63_p6 }
  0xab   : > { %p2801_p3 = scmp.eq.s32.totalorder %s2292_s19, 0  ;;  %s51_s9 = ssub.s32 %s2185_s17, %s2827_s21 }
  0xac   : > { %p254_p10 = scmp.eq.s32.totalorder %s2292_s19, 7  ;;  %p54_p11 = scmp.eq.s32.totalorder %s51_s9, 0 }
  0xad   : > { %p2443_p5 = por %p2801_p3, %p69_p9  ;;  %p260_p12 = scmp.eq.s32.totalorder %s2779_s25, 7 }
  0xae   : > { %p2452_p13 = por %p254_p10, %p63_p6  ;;  %p1762_p0 = scmp.lt.s32.totalorder %s2189_s18, 8 }
  0xaf   : > { %s2802_s10 = scalar_select %p2443_p5, 1, 0 }
  0xb0   : > { %s2803_s23 = scalar_select %p2452_p13, 1, 0 }
  0xb1   : > { %s2458_s24 = scalar_select %p54_p11, %s2177_s15, %s56_s3  }
  0xb2   : > { %p2460_p2 = por %p260_p12, %p69_p9  ;;  %s404_s12 = sand.u32 1, %s2177_s15  }
  0xb3   : > { %s2465_s26 = sshll.u32 %s404_s12, 3  ;;  %s1297_s28 = sshll.u32 %s2185_s17, 7 }
  0xb4   : > { %s2804_s11 = scalar_select %p2460_p2, 1, 0 }
  0xb5   : > { %s2471_s2 = scalar_lea.hbm %s2763_s0, %s1297_s28  ;;  %s408_s30 = scalar_lea.vmem [#allocation4], %s2465_s26 }
  0xb6   : > { %s416_s27 = sshll.u32 %s408_s30, 4  ;;  %p2478_p4 = pnand %p1762_p0, %p2437_p1  ;;  %s2474_s27 = int_to_ptr.vmem [resolvable:$true] %s416_s27 }
  0xb7   : > { %s2485_s22 = scalar_lea.hbm %s2764_s1, %s1297_s28  ;;  %s423_s29 = sand.u32 1, %s2189_s18  }
  0xb8   : > { %s405_s4 = scalar_lea.sflag [#allocation5], %s404_s12  ;;  %s1971_s5 = scalar_lea.hbm %s2471_s2, 128 }
  0xb9   : > { %p1972_p7 = scmp.ne.s32.totalorder %s2471_s2, %s1971_s5  ;;  %p1973_p6 = pneg %p2478_p4 }
  0xba   : > { %s1976_s7 = scalar_lea.hbm %s2763_s0, 1024  ;;  %p1977_p1 = scmp.lt.u32.totalorder %s2471_s2, %s2763_s0 }
  0xbb   : > { %p1974_p8 = pnand %p1973_p6, %p1972_p7  ;;  %p1978_p3 = scmp.lt.u32.totalorder %s1976_s7, %s1971_s5 }
  0xbc   : > { %p1980_p11 = scmp.lt.u32.totalorder %s1971_s5, %s2471_s2 }
  0xbd   : > { %p1975_p9 = pneg %p1974_p8  ;;  %p1979_p10 = por %p1978_p3, %p1977_p1 }
  0xbf   : > { %p1981_p12 = por %p1980_p11, %p1979_p10 }
  0xc1   : > { %p1982_p0 = pnand %p1981_p12, %p1975_p9 }
  0xc3   : > { %1985 = shalt.err (!%p1982_p0)
}
  0xc4   : > { %s1986_s12 = scalar_lea.vmem %s2474_s27, 128  ;;  %s2198_s28 = smov [#allocation4]  }
  0xc5   : > { %p1987_p7 = scmp.ne.s32.totalorder %s2474_s27, %s1986_s12  ;;  %s1991_s9 = sshll.u32 %s2198_s28, 4  ;;  %s1992_s9 = int_to_ptr.vmem [resolvable:$false] %s1991_s9 }
  0xc6   : > { %s1993_s21 = scalar_lea.vmem %s1992_s9, 256  ;;  %p1994_p13 = scmp.lt.s32.totalorder %s2474_s27, %s1992_s9 }
  0xc7   : > { %p1989_p8 = pnand %p1987_p7, %p1973_p6  ;;  %p1995_p1 = scmp.lt.s32.totalorder %s1993_s21, %s1986_s12 }
  0xc9   : > { %p1990_p2 = pneg %p1989_p8  ;;  %p1996_p3 = por %p1995_p1, %p1994_p13 }
  0xcb   : > { %p1997_p10 = pnand %p1996_p3, %p1990_p2 }
  0xcd   : > { %2000 = shalt.err (!%p1997_p10)
}
  0xce   : > { %1743 = dma.hbm_to_vmem [thread:$0]  (!%p2478_p4), %s2471_s2, 128, %s2474_s27, %s405_s4  }
  0xcf   : > { %s427_s5 = scalar_lea.vmem [#allocation7], %s2465_s26  ;;  %s424_s8 = scalar_lea.sflag [#allocation8], %s423_s29 }
  0xd0   : > { %s435_s7 = sshll.u32 %s427_s5, 4  ;;  %s2001_s30 = scalar_lea.hbm %s2485_s22, 128  ;;  %s436_s7 = int_to_ptr.vmem [resolvable:$true] %s435_s7 }
  0xd1   : > { %p2002_p13 = scmp.ne.s32.totalorder %s2485_s22, %s2001_s30  ;;  %s2006_s28 = scalar_lea.hbm %s2764_s1, 1024 }
  0xd2   : > { %p2007_p11 = scmp.lt.u32.totalorder %s2485_s22, %s2764_s1  ;;  %p2008_p12 = scmp.lt.u32.totalorder %s2006_s28, %s2001_s30 }
  0xd3   : > { %p2004_p2 = pnand %p2002_p13, %p1973_p6  ;;  %p2010_p7 = scmp.lt.u32.totalorder %s2001_s30, %s2485_s22 }
  0xd4   : > { %p2009_p0 = por %p2008_p12, %p2007_p11 }
  0xd5   : > { %p2005_p9 = pneg %p2004_p2 }
  0xd6   : > { %p2011_p8 = por %p2010_p7, %p2009_p0 }
  0xd8   : > { %p2012_p1 = pnand %p2011_p8, %p2005_p9 }
  0xda   : > { %2015 = shalt.err (!%p2012_p1)
}
  0xdb   : > { %s2016_s4 = scalar_lea.vmem %s436_s7, 128  ;;  %s2199_s26 = smov [#allocation7]  }
  0xdc   : > { %p2017_p3 = scmp.ne.s32.totalorder %s436_s7, %s2016_s4  ;;  %s2021_s2 = sshll.u32 %s2199_s26, 4  ;;  %s2022_s2 = int_to_ptr.vmem [resolvable:$false] %s2021_s2 }
  0xdd   : > { %s2023_s27 = scalar_lea.vmem %s2022_s2, 256  ;;  %p2024_p2 = scmp.lt.s32.totalorder %s436_s7, %s2022_s2 }
  0xde   : > { %p2019_p10 = pnand %p2017_p3, %p1973_p6  ;;  %p2025_p5 = scmp.lt.s32.totalorder %s2023_s27, %s2016_s4 }
  0xe0   : > { %p2020_p13 = pneg %p2019_p10  ;;  %p2026_p11 = por %p2025_p5, %p2024_p2 }
  0xe2   : > { %p2027_p12 = pnand %p2026_p11, %p2020_p13 }
  0xe4   : > { %2030 = shalt.err (!%p2027_p12)
}
  0xe5   : > { %1746 = dma.hbm_to_vmem [thread:$0]  (!%p2478_p4), %s2485_s22, 128, %s436_s7, %s424_s8  }
  0xe6   : > { %p2806_p9 = scmp.ne.s32.totalorder %s2791_s20, 0 }
  0xe7   : > { %s2538_s29 = sand.u32 (!%p2806_p9), 1, %s2173_s14   ;;  %p2807_p5 = scmp.ne.s32.totalorder (!%p2806_p9), %s2802_s10, 0 }
  0xe8   : > { %444 = sbr.rel (%p2806_p9) target bundleno = 1221 (0x4c5), region = 52  ;;  %s2541_s5 = sshll.u32 (!%p2806_p9), %s2538_s29, 3 }
  0xe9   : > { %s447_s30 = scalar_lea.sflag (!%p2806_p9), [#allocation5], %s2538_s29  ;;  %s450_s25 = scalar_lea.vmem (!%p2806_p9), [#allocation4], %s2541_s5 }
  0xef   : > { %2140 = dma.done.wait (%p2807_p5), %s447_s30, 128  }
  0xf0   : > { %2142 = vsyncadd (%p2807_p5), %s447_s30, 4294967168  ;;  %s455_s20 = sand.u32 1, %s2292_s19   ;;  %s459_s22 = scalar_lea.vmem [#allocation7], %s2541_s5 }
  0xf1   : > { %s456_s3 = scalar_lea.sflag [#allocation8], %s455_s20 }
  0xf2   : > { %2144 = dma.done.wait (%p2807_p5), %s456_s3, 128  }
  0xf3   : > { %2146 = vsyncadd (%p2807_p5), %s456_s3, 4294967168  ;;  %p2808_p4 = scmp.eq.s32.totalorder %s2292_s19, 0 }
  0xf5   : > { %2148 = dma.done.wait (%p2808_p4), [#allocation8], 128   ;;  %p2809_p6 = pmov %p2808_p4 }
  0xf6   : > { %p2810_p0 = pmov %p2808_p4 }
  0xf7   : > { %2150 = vsyncadd (%p2809_p6), [#allocation8], 4294967168 }
  0xf8   : > { %2152 = dma.done.wait (%p2810_p0), [#allocation11], 4096   ;;  %p2811_p7 = pmov %p2810_p0 }
  0xf9   : > { %p2812_p8 = pmov %p2810_p0 }
  0xfa   : > { %2154 = vsyncadd (%p2811_p7), [#allocation11], 4294963200 }
  0xfb   : > { %2156 = dma.done.wait (%p2812_p8), [#allocation14], 8192   ;;  %p2813_p1 = pmov %p2810_p0 }
  0xfc   : > { %s516_s10 = scalar_lea.vmem [#allocation16], %s2541_s5  ;;  %s523_s7 = scalar_lea.vmem [#allocation17], %s2541_s5 }
  0xfd   : > { %2158 = vsyncadd (%p2813_p1), [#allocation14], 4294959104  ;;  %s530_s8 = scalar_lea.vmem [#allocation19], %s2541_s5  ;;  %p1311_p3 = scmp.ne.s32.totalorder %s2181_s16, 0 }
  0xfe   : > { %v535_v0 = vld [vmem:[#allocation9] sm:$0xff] (!%p1311_p3) }
  0xff   : > { %534 = sbr.rel (%p1311_p3) target bundleno = 262 (0x106), region = 84  ;;  %536 = vst [vmem:[#allocation2] sm:$0xff] (!%p1311_p3), %v535_v0 }
 0x106 PF: > { %v539_v1 = vld [vmem:[#allocation10] sm:$0xff]  ;;  %v540_v2 = vld [vmem:[#allocation10 + $0x8] sm:$0xff]  ;;  %v541_v3 = vld [vmem:[#allocation10 + $0x10] sm:$0xff]  ;;  %v2200_v4 = vmov 0.0|0.0   ;;  %vm2201_vm0 = vmmov 0   ;;  %v2202_v7 = vmov 0.0  }
 0x107   : > { %1566 = vmatprep.subr.bf16.mxu0 %v2200_v4  ;;  %v1567_v5 = vpack.c.bf16 %v540_v2, %v539_v1  ;;  %v542_v6 = vld [vmem:[#allocation10 + $0x18] sm:$0xff]  ;;  %1458 = vmatprep.mubr.msk.f32.mxu0 %vm2201_vm0, %v2202_v7  ;;  %v543_v9 = vld [vmem:[#allocation10 + $0x20] sm:$0xff]  ;;  %v544_v10 = vld [vmem:[#allocation10 + $0x28] sm:$0xff]  ;;  %s2633_s2 = sshll.u32 %s2181_s16, 7  ;;  %s1043_s27 = sshll.u32 %s516_s10, 4  ;;  %s2643_s27 = int_to_ptr.vmem [resolvable:$true] %s1043_s27 }
 0x108   : > { %1590 = vmatprep.subr.bf16.mxu1 %v2200_v4  ;;  %1493 = vmatprep.mubr.msk.f32.mxu1 %vm2201_vm0, %v2202_v7  ;;  %v1570_v8 = vpack.c.bf16 %v542_v6, %v541_v3  ;;  %v631_v11 = vld [vmem:[#allocation12] sm:$0xff]  ;;  %v632_v12 = vld [vmem:[#allocation12 + $0x8] sm:$0xff]  ;;  %v633_v13 = vld [vmem:[#allocation12 + $0x10] sm:$0xff]  ;;  %v1573_v15 = vpack.c.bf16 %v544_v10, %v543_v9  ;;  %s2814_s3 = sld [smem:[#allocation33_spill]]  ;;  %s1019_s16 = scalar_lea.sflag [#allocation6], %s2538_s29 }
 0x109   : > { %1568 = vmatpush3.bf16.msra.mxu0 %v1567_v5  ;;  %v634_v14 = vld [vmem:[#allocation12 + $0x18] sm:$0xff]  ;;  %v1591_v16 = vpack.c.bf16 %v632_v12, %v631_v11  ;;  %v545_v17 = vld [vmem:[#allocation10 + $0x30] sm:$0xff]  ;;  %v635_v20 = vld [vmem:[#allocation12 + $0x20] sm:$0xff]  ;;  %s2031_s12 = scalar_lea.vmem %s2643_s27, 128  ;;  %p2815_p13 = scmp.ne.s32.totalorder %s2803_s23, 0 }
 0x10a   : > { %1569 = vmatprep.subr.bf16.mxu0 %v2200_v4  ;;  %v546_v18 = vld [vmem:[#allocation10 + $0x38] sm:$0xff]  ;;  %v1594_v19 = vpack.c.bf16 %v634_v14, %v633_v13  ;;  %v636_v21 = vld [vmem:[#allocation12 + $0x28] sm:$0xff]  ;;  %v547_v23 = vld [vmem:[#allocation10 + $0x40] sm:$0xff]  ;;  %p2032_p10 = scmp.ne.s32.totalorder %s2643_s27, %s2031_s12  ;;  %s2203_s28 = smov [#allocation16]  }
 0x10b   : > { %1592 = vmatpush3.bf16.msra.mxu1 %v1591_v16  ;;  %v1576_v22 = vpack.c.bf16 %v546_v18, %v545_v17  ;;  %v548_v24 = vld [vmem:[#allocation10 + $0x48] sm:$0xff]  ;;  %v1597_v25 = vpack.c.bf16 %v636_v21, %v635_v20  ;;  %v637_v26 = vld [vmem:[#allocation12 + $0x30] sm:$0xff]  ;;  %v638_v27 = vld [vmem:[#allocation12 + $0x38] sm:$0xff]  ;;  %s2035_s9 = sshll.u32 %s2203_s28, 4  ;;  %s2036_s9 = int_to_ptr.vmem [resolvable:$false] %s2035_s9 }
 0x10c   : > { %1593 = vmatprep.subr.bf16.mxu1 %v2200_v4  ;;  %v1579_v28 = vpack.c.bf16 %v548_v24, %v547_v23  ;;  %v549_v29 = vld [vmem:[#allocation10 + $0x50] sm:$0xff]  ;;  %v550_v30 = vld [vmem:[#allocation10 + $0x58] sm:$0xff]  ;;  %v1600_v31 = vpack.c.bf16 %v638_v27, %v637_v26  ;;  %v639_v32 = vld [vmem:[#allocation12 + $0x40] sm:$0xff]  ;;  %p2033_p2 = pnand %p2032_p10, %p2815_p13  ;;  %s2037_s21 = scalar_lea.vmem %s2036_s9, 256 }
 0x10d   : > { %1571 = vmatpush3.bf16.msra.mxu0 %v1570_v8  ;;  %v640_v33 = vld [vmem:[#allocation12 + $0x48] sm:$0xff]  ;;  %v1582_v34 = vpack.c.bf16 %v550_v30, %v549_v29  ;;  %v551_v35 = vld [vmem:[#allocation10 + $0x60] sm:$0xff]  ;;  %v641_v38 = vld [vmem:[#allocation12 + $0x50] sm:$0xff]  ;;  %p2038_p12 = scmp.lt.s32.totalorder %s2643_s27, %s2036_s9  ;;  %p2039_p9 = scmp.lt.s32.totalorder %s2037_s21, %s2031_s12 }
 0x10e   : > { %1572 = vmatprep.subr.bf16.mxu0 %v2200_v4  ;;  %v552_v36 = vld [vmem:[#allocation10 + $0x68] sm:$0xff]  ;;  %v1603_v37 = vpack.c.bf16 %v640_v33, %v639_v32  ;;  %v642_v39 = vld [vmem:[#allocation12 + $0x58] sm:$0xff]  ;;  %v553_v41 = vld [vmem:[#allocation10 + $0x70] sm:$0xff]  ;;  %p2034_p11 = pneg %p2033_p2 }
 0x10f   : > { %1595 = vmatpush3.bf16.msra.mxu1 %v1594_v19  ;;  %v1585_v40 = vpack.c.bf16 %v552_v36, %v551_v35  ;;  %v554_v42 = vld [vmem:[#allocation10 + $0x78] sm:$0xff]  ;;  %v1606_v43 = vpack.c.bf16 %v642_v39, %v641_v38  ;;  %v643_v44 = vld [vmem:[#allocation12 + $0x60] sm:$0xff]  ;;  %v644_v45 = vld [vmem:[#allocation12 + $0x68] sm:$0xff]  ;;  %p2040_p5 = por %p2039_p9, %p2038_p12 }
 0x110   : > { %1596 = vmatprep.subr.bf16.mxu1 %v2200_v4  ;;  %v1588_v46 = vpack.c.bf16 %v554_v42, %v553_v41  ;;  %v1609_v47 = vpack.c.bf16 %v644_v45, %v643_v44  ;;  %v537_v48 = vld [vmem:[%s450_s25] sm:$0xff]  ;;  %v645_v49 = vld [vmem:[#allocation12 + $0x70] sm:$0xff]  ;;  %v724_v53 = vld [vmem:[#allocation13 + $0x8] sm:$0xff] }
 0x111   : > { %1574 = vmatpush3.bf16.msra.mxu0 %v1573_v15  ;;  %v646_v50 = vld [vmem:[#allocation12 + $0x78] sm:$0xff]  ;;  %v723_v52 = vld [vmem:[#allocation13] sm:$0xff]  ;;  %v725_v54 = vld [vmem:[#allocation13 + $0x10] sm:$0xff]  ;;  %p2041_p4 = pnand %p2040_p5, %p2034_p11 }
 0x112   : > { %1575 = vmatprep.subr.bf16.mxu0 %v2200_v4  ;;  %v1612_v51 = vpack.c.bf16 %v646_v50, %v645_v49  ;;  %v1615_v55 = vpack.c.bf16 %v724_v53, %v723_v52  ;;  %v726_v56 = vld [vmem:[#allocation13 + $0x18] sm:$0xff]  ;;  %v727_v58 = vld [vmem:[#allocation13 + $0x20] sm:$0xff]  ;;  %v728_v59 = vld [vmem:[#allocation13 + $0x28] sm:$0xff] }
 0x113   : > { %1598 = vmatpush3.bf16.msra.mxu1 %v1597_v25  ;;  %v1618_v57 = vpack.c.bf16 %v726_v56, %v725_v54  ;;  %v1621_v60 = vpack.c.bf16 %v728_v59, %v727_v58  ;;  %v729_v61 = vld [vmem:[#allocation13 + $0x30] sm:$0xff]  ;;  %v730_v62 = vld [vmem:[#allocation13 + $0x38] sm:$0xff]  ;;  %v731_v0 = vld [vmem:[#allocation13 + $0x40] sm:$0xff] }
 0x114   : > { %1599 = vmatprep.subr.bf16.mxu1 %v2200_v4  ;;  %v1624_v63 = vpack.c.bf16 %v730_v62, %v729_v61  ;;  %v732_v1 = vld [vmem:[#allocation13 + $0x48] sm:$0xff]  ;;  %v733_v3 = vld [vmem:[#allocation13 + $0x50] sm:$0xff]  ;;  %v734_v5 = vld [vmem:[#allocation13 + $0x58] sm:$0xff] }
 0x115   : > { %1577 = vmatpush3.bf16.msra.mxu0 %v1576_v22  ;;  %v1627_v2 = vpack.c.bf16 %v732_v1, %v731_v0  ;;  %v1630_v6 = vpack.c.bf16 %v734_v5, %v733_v3  ;;  %v735_v8 = vld [vmem:[#allocation13 + $0x60] sm:$0xff]  ;;  %v736_v9 = vld [vmem:[#allocation13 + $0x68] sm:$0xff]  ;;  %v1312_v11 = vld [vmem:[%s2769_s6] ss:$0 sm:$0xff] }
 0x116   : > { %1578 = vmatprep.subr.bf16.mxu0 %v2200_v4  ;;  %v1633_v10 = vpack.c.bf16 %v736_v9, %v735_v8  ;;  %v737_v16 = vld [vmem:[#allocation13 + $0x70] sm:$0xff]  ;;  %v738_v17 = vld [vmem:[#allocation13 + $0x78] sm:$0xff]  ;;  %v839_v19 = vld [vmem:[#allocation15 + $0x80] sm:$0xff] }
 0x117   : > { %1601 = vmatpush3.bf16.msra.mxu1 %v1600_v31  ;;  %v1636_v18 = vpack.c.bf16 %v738_v17, %v737_v16  ;;  %v840_v20 = vld [vmem:[#allocation15 + $0x88] sm:$0xff]  ;;  %v823_v21 = vld [vmem:[#allocation15] sm:$0xff]  ;;  %v841_v24 = vld [vmem:[#allocation15 + $0x90] sm:$0xff] }
 0x118   : > { %1602 = vmatprep.subr.bf16.mxu1 %v2200_v4  ;;  %v1638_v22 = vpack.c.bf16 %v840_v20, %v839_v19  ;;  %v824_v23 = vld [vmem:[#allocation15 + $0x8] sm:$0xff]  ;;  %v842_v25 = vld [vmem:[#allocation15 + $0x98] sm:$0xff]  ;;  %v843_v30 = vld [vmem:[#allocation15 + $0xa0] sm:$0xff] }
 0x119   : > { %1580 = vmatpush3.bf16.msra.mxu0 %v1579_v28  ;;  %v1640_v26 = vpack.c.bf16 %v824_v23, %v823_v21  ;;  %v1642_v27 = vpack.c.bf16 %v842_v25, %v841_v24  ;;  %v825_v28 = vld [vmem:[#allocation15 + $0x10] sm:$0xff]  ;;  %v826_v29 = vld [vmem:[#allocation15 + $0x18] sm:$0xff]  ;;  %v844_v31 = vld [vmem:[#allocation15 + $0xa8] sm:$0xff] }
 0x11a   : > { %1581 = vmatprep.subr.bf16.mxu0 %v2200_v4  ;;  %v1644_v32 = vpack.c.bf16 %v826_v29, %v825_v28  ;;  %v1646_v33 = vpack.c.bf16 %v844_v31, %v843_v30  ;;  %v828_v35 = vld [vmem:[#allocation15 + $0x28] sm:$0xff]  ;;  %v845_v36 = vld [vmem:[#allocation15 + $0xb0] sm:$0xff]  ;;  %v830_v41 = vld [vmem:[#allocation15 + $0x38] sm:$0xff] }
 0x11b   : > { %1604 = vmatpush3.bf16.msra.mxu1 %v1603_v37  ;;  %v846_v37 = vld [vmem:[#allocation15 + $0xb8] sm:$0xff]  ;;  %v847_v42 = vld [vmem:[#allocation15 + $0xc0] sm:$0xff]  ;;  %v833_v52 = vld [vmem:[#allocation15 + $0x50] sm:$0xff] }
 0x11c   : > { %1605 = vmatprep.subr.bf16.mxu1 %v2200_v4  ;;  %v1650_v39 = vpack.c.bf16 %v846_v37, %v845_v36  ;;  %v850_v49 = vld [vmem:[#allocation15 + $0xd8] sm:$0xff]  ;;  %v851_v54 = vld [vmem:[#allocation15 + $0xe0] sm:$0xff]  ;;  %v836_v59 = vld [vmem:[#allocation15 + $0x68] sm:$0xff] }
 0x11d   : > { %1583 = vmatpush3.bf16.msra.mxu0 %v1582_v34  ;;  %v827_v34 = vld [vmem:[#allocation15 + $0x20] sm:$0xff]  ;;  %v834_v53 = vld [vmem:[#allocation15 + $0x58] sm:$0xff]  ;;  %v2611_v3 = vld [vmem:[#allocation2] sm:$0xff] }
 0x11e   : > { %1584 = vmatprep.subr.bf16.mxu0 %v2200_v4  ;;  %v1648_v38 = vpack.c.bf16 %v828_v35, %v827_v34  ;;  %v1660_v56 = vpack.c.bf16 %v834_v53, %v833_v52  ;;  %v835_v58 = vld [vmem:[#allocation15 + $0x60] sm:$0xff]  ;;  %v854_v61 = vld [vmem:[#allocation15 + $0xf8] sm:$0xff]  ;;  %1827 = vtanh.f32 %v2611_v3  ;;  %v1313_v8 = vld [vmem:[%s2769_s6 + $0x1] ss:$0 sm:$0xff] }
 0x11f   : > { %1607 = vmatpush3.bf16.msra.mxu1 %v1606_v43  ;;  %v848_v43 = vld [vmem:[#allocation15 + $0xc8] sm:$0xff]  ;;  %v1664_v62 = vpack.c.bf16 %v836_v59, %v835_v58  ;;  %v838_v1 = vld [vmem:[#allocation15 + $0x78] sm:$0xff]  ;;  %v855_v9 = vld [vmem:[#allocation15 + $0x100] sm:$0xff] }
 0x120   : > { %1608 = vmatprep.subr.bf16.mxu1 %v2200_v4  ;;  %v1654_v45 = vpack.c.bf16 %v848_v43, %v847_v42  ;;  %v857_v16 = vld [vmem:[#allocation15 + $0x110] sm:$0xff]  ;;  %v858_v17 = vld [vmem:[#allocation15 + $0x118] sm:$0xff]  ;;  %v859_v19 = vld [vmem:[#allocation15 + $0x120] sm:$0xff] }
 0x121   : > { %1586 = vmatpush3.bf16.msra.mxu0 %v1585_v40  ;;  %v829_v40 = vld [vmem:[#allocation15 + $0x30] sm:$0xff]  ;;  %v860_v20 = vld [vmem:[#allocation15 + $0x128] sm:$0xff]  ;;  %v862_v23 = vld [vmem:[#allocation15 + $0x138] sm:$0xff] }
 0x122   : > { %1587 = vmatprep.subr.bf16.mxu0 %v2200_v4  ;;  %v1652_v44 = vpack.c.bf16 %v830_v41, %v829_v40  ;;  %v1677_v21 = vpack.c.bf16 %v860_v20, %v859_v19  ;;  %v863_v25 = vld [vmem:[#allocation15 + $0x140] sm:$0xff]  ;;  %v866_v28 = vld [vmem:[#allocation15 + $0x158] sm:$0xff]  ;;  %v868_v31 = vld [vmem:[#allocation15 + $0x168] sm:$0xff] }
 0x123   : > { %1610 = vmatpush3.bf16.msra.mxu1 %v1609_v47  ;;  %v832_v47 = vld [vmem:[#allocation15 + $0x48] sm:$0xff]  ;;  %v867_v30 = vld [vmem:[#allocation15 + $0x160] sm:$0xff]  ;;  %v870_v34 = vld [vmem:[#allocation15 + $0x178] sm:$0xff] }
 0x124   : > { %1611 = vmatprep.subr.bf16.mxu1 %v2200_v4 }
 0x125   : > { %1589 = vmatpush3.bf16.msra.mxu0 %v1588_v46  ;;  %v831_v46 = vld [vmem:[#allocation15 + $0x40] sm:$0xff] }
 0x126   : > { %1614 = vmatprep.subr.bf16.mxu0 %v2200_v4  ;;  %v1656_v50 = vpack.c.bf16 %v832_v47, %v831_v46 }
 0x127   : > { %1613 = vmatpush3.bf16.msra.mxu1 %v1612_v51 }
 0x128   : > { %1459 = vmatmul.mubr.f32.vlgmr.msra.gmra.mrb[0].mxu0 %v537_v48  ;;  %1639 = vmatprep.subr.bf16.mxu1 %v1638_v22  ;;  %v849_v48 = vld [vmem:[#allocation15 + $0xd0] sm:$0xff] }
 0x129   : > { %1528 = vmatprep.mubr.msk.f32.mxu0 %vm2201_vm0, %v2202_v7  ;;  %1616 = vmatpush3.bf16.msra.mxu0 %v1615_v55  ;;  %v1658_v51 = vpack.c.bf16 %v850_v49, %v849_v48  ;;  %v852_v55 = vld [vmem:[#allocation15 + $0xe8] sm:$0xff]  ;;  %v861_v22 = vld [vmem:[#allocation15 + $0x130] sm:$0xff] }
 0x12a   : > { %1617 = vmatprep.subr.bf16.mxu0 %v2200_v4  ;;  %v1680_v24 = vpack.c.bf16 %v862_v23, %v861_v22 }
 0x12d   : > { %1619 = vmatpush3.bf16.msra.mxu0 %v1618_v57  ;;  %v1662_v57 = vpack.c.bf16 %v852_v55, %v851_v54 }
 0x12e   : > { %1620 = vmatprep.subr.bf16.mxu0 %v2200_v4 }
 0x131   : > { %1622 = vmatpush3.bf16.msra.mxu0 %v1621_v60  ;;  %v853_v60 = vld [vmem:[#allocation15 + $0xf0] sm:$0xff] }
 0x132   : > { %1623 = vmatprep.subr.bf16.mxu0 %v2200_v4  ;;  %v1666_v0 = vpack.c.bf16 %v854_v61, %v853_v60 }
 0x135   : > { %1625 = vmatpush3.bf16.msra.mxu0 %v1624_v63  ;;  %v837_v63 = vld [vmem:[#allocation15 + $0x70] sm:$0xff] }
 0x136   : > { %1626 = vmatprep.subr.bf16.mxu0 %v2200_v4  ;;  %v1668_v5 = vpack.c.bf16 %v838_v1, %v837_v63 }
 0x139   : > { %1628 = vmatpush3.bf16.msra.mxu0 %v1627_v2  ;;  %v817_v2 = vld [vmem:[%s459_s22] sm:$0xff]  ;;  %s2641_s22 = scalar_lea.hbm %s2814_s3, %s2633_s2 }
 0x13a   : > { %1629 = vmatprep.subr.bf16.mxu0 %v2200_v4 }
 0x13d   : > { %1631 = vmatpush3.bf16.msra.mxu0 %v1630_v6  ;;  %v1828_v6 = vpop.eup %1827 }
 0x13e   : > { %1632 = vmatprep.subr.bf16.mxu0 %v2200_v4 }
 0x141   : > { %1634 = vmatpush3.bf16.msra.mxu0 %v1633_v10  ;;  %v856_v10 = vld [vmem:[#allocation15 + $0x108] sm:$0xff] }
 0x142   : > { %1635 = vmatprep.subr.bf16.mxu0 %v2200_v4 }
 0x145   : > { %1637 = vmatpush3.bf16.msra.mxu0 %v1636_v18  ;;  %v1674_v18 = vpack.c.bf16 %v858_v17, %v857_v16 }
 0x146   : > { %1670 = vmatprep.subr.bf16.mxu0 %v2200_v4 }
 0x1fb   : > { %v625_v12 = vpop.f32.mrb[0].mxu0 }
 0x1fc   : > { %v626_v13 = vadd.f32 %v1312_v11, %v625_v12  ;;  %v1460_v14 = vpop.f32.mrb[1].mxu0 }
 0x1fd   : > { %v1671_v14 = vpack.c.bf16 %v856_v10, %v855_v9 }
 0x1fe   : > { %v629_v15 = vmax.f32 %v626_v13, 0.0 }
 0x200   : > { %1494 = vmatmul.mubr.f32.vlgmr.msra.gmra.mrb[0].mxu1 %v629_v15 }
 0x201   : > { %1641 = vmatpush3.bf16.msra.mxu1 %v1640_v26  ;;  %935 = vmatprep.mubr.f32.mxu1 %v817_v2  ;;  %v864_v26 = vld [vmem:[#allocation15 + $0x148] sm:$0xff] }
 0x202   : > { %1643 = vmatprep.subr.bf16.mxu1 %v1642_v27  ;;  %v1683_v27 = vpack.c.bf16 %v864_v26, %v863_v25 }
 0x205   : > { %1645 = vmatpush3.bf16.msra.mxu1 %v1644_v32  ;;  %v1689_v32 = vpack.c.bf16 %v868_v31, %v867_v30 }
 0x206   : > { %1647 = vmatprep.subr.bf16.mxu1 %v1646_v33  ;;  %v869_v33 = vld [vmem:[#allocation15 + $0x170] sm:$0xff] }
 0x207   : > { %v1692_v35 = vpack.c.bf16 %v870_v34, %v869_v33 }
 0x209   : > { %1649 = vmatpush3.bf16.msra.mxu1 %v1648_v38 }
 0x20a   : > { %1651 = vmatprep.subr.bf16.mxu1 %v1650_v39  ;;  %v1314_v39 = vld [vmem:[%s2769_s6 + $0x2] ss:$0 sm:$0xff] }
 0x20d   : > { %1653 = vmatpush3.bf16.msra.mxu1 %v1652_v44  ;;  %v1011_v44 = vmul.f32 0.6666667, %v2611_v3 }
 0x20e   : > { %1655 = vmatprep.subr.bf16.mxu1 %v1654_v45 }
 0x211   : > { %1657 = vmatpush3.bf16.msra.mxu1 %v1656_v50 }
 0x212   : > { %1659 = vmatprep.subr.bf16.mxu1 %v1658_v51 }
 0x215   : > { %1661 = vmatpush3.bf16.msra.mxu1 %v1660_v56 }
 0x216   : > { %1663 = vmatprep.subr.bf16.mxu1 %v1662_v57 }
 0x219   : > { %1665 = vmatpush3.bf16.msra.mxu1 %v1664_v62 }
 0x21a   : > { %1667 = vmatprep.subr.bf16.mxu1 %v1666_v0 }
 0x21d   : > { %1669 = vmatpush3.bf16.msra.mxu1 %v1668_v5 }
 0x220   : > { %936 = vmatmul.mubr.f32.vlgmr.msra.gmra.mrb[2].mxu1 %v1828_v6 }
 0x2d3   : > { %v717_v11 = vpop.f32.mrb[0].mxu1 }
 0x2d4   : > { %v718_v12 = vadd.f32 %v1313_v8, %v717_v11  ;;  %v1495_v13 = vpop.f32.mrb[1].mxu1 }
 0x2d6   : > { %v721_v15 = vmax.f32 %v718_v12, 0.0 }
 0x2d8   : > { %1529 = vmatmul.mubr.f32.vlgmr.msra.gmra.mrb[2].mxu0 %v721_v15 }
 0x2d9   : > { %1672 = vmatpush3.bf16.msra.mxu0 %v1671_v14  ;;  %1563 = vmatprep.mubr.msk.f32.mxu0 %vm2201_vm0, %v2202_v7  ;;  %v865_v7 = vld [vmem:[#allocation15 + $0x150] sm:$0xff] }
 0x2da   : > { %1673 = vmatprep.subr.bf16.mxu0 %v2200_v4  ;;  %v1686_v29 = vpack.c.bf16 %v866_v28, %v865_v7 }
 0x2dd   : > { %1675 = vmatpush3.bf16.msra.mxu0 %v1674_v18 }
 0x2de   : > { %1676 = vmatprep.subr.bf16.mxu0 %v2200_v4 }
 0x2e1   : > { %1678 = vmatpush3.bf16.msra.mxu0 %v1677_v21 }
 0x2e2   : > { %1679 = vmatprep.subr.bf16.mxu0 %v2200_v4 }
 0x2e5   : > { %1681 = vmatpush3.bf16.msra.mxu0 %v1680_v24 }
 0x2e6   : > { %1682 = vmatprep.subr.bf16.mxu0 %v2200_v4 }
 0x2e9   : > { %1684 = vmatpush3.bf16.msra.mxu0 %v1683_v27 }
 0x2ea   : > { %1685 = vmatprep.subr.bf16.mxu0 %v2200_v4 }
 0x2ed   : > { %1687 = vmatpush3.bf16.msra.mxu0 %v1686_v29 }
 0x2ee   : > { %1688 = vmatprep.subr.bf16.mxu0 %v2200_v4 }
 0x2f1   : > { %1690 = vmatpush3.bf16.msra.mxu0 %v1689_v32 }
 0x2f2   : > { %1691 = vmatprep.subr.bf16.mxu0 %v2200_v4 }
 0x2f3   : > { %v1406_v36 = vpop.f32.mrb[2].mxu1 }
 0x2f4   : > { %v1407_v37 = vpop.f32.mrb[3].mxu1 }
 0x2f5   : > { %1693 = vmatpush3.bf16.msra.mxu0 %v1692_v35  ;;  %v1408_v38 = vadd.f32 %v1407_v37, %v1406_v36 }
 0x3ab   : > { %v809_v40 = vpop.f32.mrb[2].mxu0 }
 0x3ac   : > { %v810_v41 = vadd.f32 %v1314_v39, %v809_v40  ;;  %v1530_v42 = vpop.f32.mrb[3].mxu0 }
 0x3ae   : > { %813 = vst [vmem:[%s530_s8] sm:$0xff] %v810_v41  ;;  %1564 = vmatmul.mubr.f32.vlgmr.msra.gmra.mrb[4].mxu0 %v810_v41 }
 0x481   : > { %v1007_v4 = vpop.f32.mrb[4].mxu0 }
 0x482   : > { %v1008_v43 = vadd.f32 %v1408_v38, %v1007_v4  ;;  %v1565_v45 = vpop.f32.mrb[5].mxu0 }
 0x484   : > { %v1012_v46 = vmul.f32 0.33333334, %v1008_v43 }
 0x486   : > { %v1013_v47 = vadd.f32 %v1012_v46, %v1011_v44 }
 0x488   : > { %1014 = vst [vmem:[#allocation2] sm:$0xff] %v1013_v47  ;;  %1015 = vst [vmem:[%s516_s10] sm:$0xff] %v1013_v47  ;;  %1829 = vtanh.f32 %v1013_v47 }
 0x489   : > { %2044 = shalt.err (!%p2041_p4)
}
 0x48a   : > { %s2045_s29 = scalar_lea.hbm %s2641_s22, 128  ;;  %s2049_s26 = scalar_lea.hbm %s2814_s3, 1024 }
 0x48b   : > { %p2046_p6 = scmp.ne.s32.totalorder %s2641_s22, %s2045_s29  ;;  %p2050_p8 = scmp.lt.u32.totalorder %s2641_s22, %s2814_s3 }
 0x48c   : > { %p2051_p1 = scmp.lt.u32.totalorder %s2049_s26, %s2045_s29  ;;  %p2053_p10 = scmp.lt.u32.totalorder %s2045_s29, %s2641_s22 }
 0x48d   : > { %p2047_p0 = pnand %p2046_p6, %p2815_p13 }
 0x48e   : > { %p2052_p3 = por %p2051_p1, %p2050_p8 }
 0x48f   : > { %p2048_p7 = pneg %p2047_p0 }
 0x490   : > { %p2054_p2 = por %p2053_p10, %p2052_p3 }
 0x492   : > { %p2055_p11 = pnand %p2054_p2, %p2048_p7 }
 0x494   : > { %2058 = shalt.err (!%p2055_p11)
}
 0x495   : > { %1718 = dma.vmem_to_hbm [thread:$0]  (%p2815_p13), %s2643_s27, 128, %s2641_s22, %s1019_s16   ;;  %v1830_v48 = vpop.eup %1829 }
 0x496   : > { %s1057_s12 = sshll.u32 %s523_s7, 4  ;;  %s1071_s28 = sshll.u32 %s530_s8, 4  ;;  %1017 = vst [vmem:[%s523_s7] sm:$0xff] %v1830_v48  ;;  %s2679_s12 = int_to_ptr.vmem [resolvable:$true] %s1057_s12  ;;  %s2687_s28 = int_to_ptr.vmem [resolvable:$true] %s1071_s28 }
 0x497   : > { %s2816_s29 = sld [smem:[#allocation34_spill]]  ;;  %s2817_s30 = sld [smem:[#allocation35_spill]] }
 0x498   : > { %s2693_s8 = scalar_lea.sflag [#allocation18], %s455_s20  ;;  %s2059_s27 = scalar_lea.vmem %s2679_s12, 128 }
 0x499   : > { %p2060_p12 = scmp.ne.s32.totalorder %s2679_s12, %s2059_s27  ;;  %s2204_s22 = smov [#allocation17]  }
 0x49a   : > { %s2063_s16 = sshll.u32 %s2204_s22, 4  ;;  %s2064_s16 = int_to_ptr.vmem [resolvable:$false] %s2063_s16 }
 0x49b   : > { %p2061_p9 = pnand %p2060_p12, %p2815_p13  ;;  %s2065_s9 = scalar_lea.vmem %s2064_s16, 256 }
 0x49c   : > { %p2066_p4 = scmp.lt.s32.totalorder %s2679_s12, %s2064_s16  ;;  %p2067_p6 = scmp.lt.s32.totalorder %s2065_s9, %s2059_s27 }
 0x49d   : > { %s2677_s10 = scalar_lea.hbm %s2816_s29, %s2633_s2  ;;  %s2685_s25 = scalar_lea.hbm %s2817_s30, %s2633_s2 }
 0x49e   : > { %p2062_p5 = pneg %p2061_p9  ;;  %p2068_p0 = por %p2067_p6, %p2066_p4 }
 0x4a0   : > { %p2069_p7 = pnand %p2068_p0, %p2062_p5 }
 0x4a2   : > { %2072 = shalt.err (!%p2069_p7)
}
 0x4a3   : > { %s2073_s19 = scalar_lea.hbm %s2677_s10, 128  ;;  %s2077_s7 = scalar_lea.hbm %s2816_s29, 1024 }
 0x4a4   : > { %p2074_p8 = scmp.ne.s32.totalorder %s2677_s10, %s2073_s19  ;;  %p2078_p10 = scmp.lt.u32.totalorder %s2677_s10, %s2816_s29 }
 0x4a5   : > { %p2079_p2 = scmp.lt.u32.totalorder %s2077_s7, %s2073_s19  ;;  %p2081_p12 = scmp.lt.u32.totalorder %s2073_s19, %s2677_s10 }
 0x4a6   : > { %p2075_p1 = pnand %p2074_p8, %p2815_p13 }
 0x4a7   : > { %p2080_p11 = por %p2079_p2, %p2078_p10 }
 0x4a8   : > { %p2076_p3 = pneg %p2075_p1 }
 0x4a9   : > { %p2082_p9 = por %p2081_p12, %p2080_p11 }
 0x4ab   : > { %p2083_p5 = pnand %p2082_p9, %p2076_p3 }
 0x4ad   : > { %2086 = shalt.err (!%p2083_p5)
}
 0x4ae   : > { %1719 = dma.vmem_to_hbm [thread:$0]  (%p2815_p13), %s2679_s12, 128, %s2677_s10, %s2693_s8  }
 0x4af   : > { %s2087_s4 = scalar_lea.vmem %s2687_s28, 128  ;;  %s2205_s26 = smov [#allocation19]  }
 0x4b0   : > { %p2088_p4 = scmp.ne.s32.totalorder %s2687_s28, %s2087_s4  ;;  %s2091_s27 = sshll.u32 %s2205_s26, 4  ;;  %s2092_s27 = int_to_ptr.vmem [resolvable:$false] %s2091_s27 }
 0x4b1   : > { %s2093_s22 = scalar_lea.vmem %s2092_s27, 256  ;;  %p2094_p7 = scmp.lt.s32.totalorder %s2687_s28, %s2092_s27 }
 0x4b2   : > { %p2089_p6 = pnand %p2088_p4, %p2815_p13  ;;  %p2095_p8 = scmp.lt.s32.totalorder %s2093_s22, %s2087_s4 }
 0x4b4   : > { %p2090_p0 = pneg %p2089_p6  ;;  %p2096_p1 = por %p2095_p8, %p2094_p7 }
 0x4b6   : > { %p2097_p3 = pnand %p2096_p1, %p2090_p0 }
 0x4b8   : > { %2100 = shalt.err (!%p2097_p3)
}
 0x4b9   : > { %s2101_s12 = scalar_lea.hbm %s2685_s25, 128  ;;  %s2105_s9 = scalar_lea.hbm %s2817_s30, 1024 }
 0x4ba   : > { %p2102_p10 = scmp.ne.s32.totalorder %s2685_s25, %s2101_s12  ;;  %p2106_p12 = scmp.lt.u32.totalorder %s2685_s25, %s2817_s30 }
 0x4bb   : > { %p2107_p9 = scmp.lt.u32.totalorder %s2105_s9, %s2101_s12  ;;  %p2109_p4 = scmp.lt.u32.totalorder %s2101_s12, %s2685_s25 }
 0x4bc   : > { %p2103_p2 = pnand %p2102_p10, %p2815_p13 }
 0x4bd   : > { %p2108_p5 = por %p2107_p9, %p2106_p12 }
 0x4be   : > { %p2104_p11 = pneg %p2103_p2 }
 0x4bf   : > { %p2110_p6 = por %p2109_p4, %p2108_p5 }
 0x4c1   : > { %p2111_p0 = pnand %p2110_p6, %p2104_p11 }
 0x4c3   : > { %2114 = shalt.err (!%p2111_p0)
}
 0x4c4   : > { %1720 = dma.vmem_to_hbm [thread:$0]  (%p2815_p13), %s2687_s28, 128, %s2685_s25, %s2693_s8  }
 0x4c5 PF: > { %p1768_p7 = scmp.ge.s32.totalorder %s2189_s18, 2  ;;  %s1083_s20 = sand.u32 1, %s2169_s13  }
 0x4c6   : > { %p2818_p8 = scmp.ne.s32.totalorder %s2804_s11, 0  ;;  %s1084_s7 = scalar_lea.sflag [#allocation6], %s1083_s20 }
 0x4c8   : > { %p1748_p1 = pnand %p1768_p7, %p2818_p8 }
 0x4ca   : > { %2160 = dma.done.wait (!%p1748_p1), %s1084_s7, 128  }
 0x4cb   : > { %2162 = vsyncadd (!%p1748_p1), %s1084_s7, 4294967168  ;;  %s2819_s2 = sadd.s32 4294967294, %s2189_s18  }
 0x4cc   : > { %s1092_s21 = sand.u32 1, %s2819_s2  }
 0x4cd   : > { %s1093_s4 = scalar_lea.sflag [#allocation18], %s1092_s21 }
 0x4ce   : > { %2164 = dma.done.wait (!%p1748_p1), %s1093_s4, 256  }
 0x4cf   : > { %2166 = vsyncadd (!%p1748_p1), %s1093_s4, 4294967040  ;;  %s35_s18 = sadd.s32 1, %s2189_s18   ;;  %s2820_s23 = sld [smem:[#allocation27_spill]] }
 0x4d0   : > { %p32_p13 = scmp.ge.s32.totalorder %s35_s18, 10   ;;  %s2821_s13 = smov %s2173_s14 }
 0x4d1   : > { %s2822_s14 = smov %s2177_s15  ;;  %s2823_s15 = smov %s2458_s24 }
 0x4d2   : > { %s2824_s16 = smov %s2185_s17  ;;  %34 = sbr.rel (!%p32_p13) target bundleno = 21 (0x15), region = 167 }
 0x4d5   : > { %s2825_s17 = smov %s2820_s23 }
 0x4d9   :  { %1107 = vsyncpa [#allocation5], 1 }
 0x4da   :  { %1109 = vsyncpa [#allocation5 + $0x1], 1 }
 0x4db   :  { %1110 = vsyncpa [#allocation8], 1 }
 0x4dc   :  { %1112 = vsyncpa [#allocation8 + $0x1], 1 }
 0x4dd   :  { %1113 = vsyncpa [#allocation11], 1 }
 0x4de   :  { %1114 = vsyncpa [#allocation14], 1 }
 0x4df   :  { %1115 = vsyncpa [#allocation6], 1 }
 0x4e0   :  { %1117 = vsyncpa [#allocation6 + $0x1], 1 }
 0x4e1   :  { %1118 = vsyncpa [#allocation18], 1 }
 0x4e2   :  { %1120 = vsyncpa [#allocation18 + $0x1], 1 }

</bundles_post_ra>
